<compile_context>
chip_gen: v5e
topology: v5e:2x2
jax: 0.10.0
libtpu: 0.0.40
codegen_flags: <defaults>
</compile_context>

<pallas_src>
import jax
import jax.numpy as jnp
from jax.experimental import pallas as pl
from jax.experimental.pallas import tpu as pltpu

MIN_WEIGHT = 0.01
MAX_WEIGHT = 0.99

N_EXPERTS = 3
N_FEATURES = 6


def _round_up(x, m):
    return ((x + m - 1) // m) * m


def _gating_kernel(w_ref, b_ref, x_ref, o_ref):
    # w_ref: (3, 6) f32 in SMEM, b_ref: (3,) f32 in SMEM
    # x_ref: (6, TB) f32 in VMEM (batch on lanes), o_ref: (3, TB) f32 in VMEM
    x = x_ref[...]                                    # (6, TB)

    # scores[j] = b[j] + sum_k w[j, k] * x[k, :]  -> 18 scalar*vector FMAs (VPU)
    scores = []
    for j in range(N_EXPERTS):
        s = b_ref[j] + w_ref[j, 0] * x[0:1, :]
        for k in range(1, N_FEATURES):
            s = s + w_ref[j, k] * x[k:k + 1, :]
        scores.append(s)                              # each (1, TB)
    s0, s1, s2 = scores

    # Numerically-stable softmax across the 3 expert rows: elementwise VPU
    # max/add across row-vregs, exp on the EUP, one exact reciprocal.
    m = jnp.maximum(jnp.maximum(s0, s1), s2)
    e0 = jnp.exp(s0 - m)
    e1 = jnp.exp(s1 - m)
    e2 = jnp.exp(s2 - m)
    inv = 1.0 / (e0 + e1 + e2)

    # clamp + renormalize (matches the PyTorch module: clip then divide).
    w0 = jnp.clip(e0 * inv, MIN_WEIGHT, MAX_WEIGHT)
    w1 = jnp.clip(e1 * inv, MIN_WEIGHT, MAX_WEIGHT)
    w2 = jnp.clip(e2 * inv, MIN_WEIGHT, MAX_WEIGHT)
    rinv = 1.0 / (w0 + w1 + w2)

    o_ref[...] = jnp.concatenate([w0 * rinv, w1 * rinv, w2 * rinv], axis=0)


def _reference(shared_context, weight_matrix, bias_vector):
    scores = shared_context @ weight_matrix.T + bias_vector
    w = jax.nn.softmax(scores, axis=-1)
    w = jnp.clip(w, MIN_WEIGHT, MAX_WEIGHT)
    return w / jnp.sum(w, axis=-1, keepdims=True)


def fast_gating_forward(shared_context, weight_matrix, bias_vector,
                        *, block_b=8192, min_pallas_rows=1024):
    """shared_context: [B, 6]; weight_matrix: [3, 6]; bias_vector: [3] -> [B, 3]."""
    B = shared_context.shape[0]
    shared_context = shared_context.astype(jnp.float32)
    weight_matrix = weight_matrix.astype(jnp.float32)
    bias_vector = bias_vector.astype(jnp.float32)

    # Tiny batches: kernel launch + pipeline prologue costs more than a fused
    # 6x3 matmul + softmax in plain XLA.
    if B < min_pallas_rows:
        return _reference(shared_context, weight_matrix, bias_vector)

    # Lane-dense layout: batch on the 128-lane axis; pad B to a tile multiple.
    x_t = shared_context.T                            # (6, B)
    tb = min(block_b, _round_up(B, 128))              # lane tile, multiple of 128
    b_pad = _round_up(B, tb)
    if b_pad != B:
        x_t = jnp.pad(x_t, ((0, 0), (0, b_pad - B)))  # zero cols -> finite softmax

    grid = (b_pad // tb,)
    out_t = pl.pallas_call(
        _gating_kernel,
        out_shape=jax.ShapeDtypeStruct((N_EXPERTS, b_pad), jnp.float32),
        grid=grid,
        in_specs=[
            pl.BlockSpec(memory_space=pltpu.MemorySpace.SMEM),   # (3, 6) weights
            pl.BlockSpec(memory_space=pltpu.MemorySpace.SMEM),   # (3,) bias
            pl.BlockSpec((N_FEATURES, tb), lambda i: (0, i)),    # (6, tb) VMEM tile
        ],
        out_specs=pl.BlockSpec((N_EXPERTS, tb), lambda i: (0, i)),
        compiler_params=pltpu.CompilerParams(
            dimension_semantics=("parallel",)),       # v7x: shard batch over 2 TCs
    )(weight_matrix, bias_vector, x_t)

    return out_t[:, :B].T                             # (B, 3)


if __name__ == "__main__":
    # Deterministic parameter init (mirrors _initialize_fast_weights).
    weight_matrix = jnp.array(
        [
            [0.4, 0.3, 0.1, 0.1, 0.05, 0.05],
            [0.1, 0.1, 0.4, 0.3, 0.05, 0.05],
            [0.3, 0.4, 0.1, 0.1, 0.1, 0.0],
        ],
        dtype=jnp.float32,
    )
    bias_vector = jnp.zeros((3,), dtype=jnp.float32)

    # Small example input: batch=200 (non-multiple of 128 exercises padding).
    key = jax.random.PRNGKey(0)
    B = 200
    shared_context = jax.random.normal(key, (B, N_FEATURES), dtype=jnp.float32)

    # min_pallas_rows=0 forces the Pallas path even at this tiny demo batch;
    # production default (1024) short-circuits tiny batches to plain XLA.
    out = fast_gating_forward(shared_context, weight_matrix, bias_vector,
                              min_pallas_rows=0)
    out = jax.block_until_ready(out)

    ref = _reference(shared_context, weight_matrix, bias_vector)
    assert out.shape == (B, N_EXPERTS)
    assert jnp.allclose(out, ref, atol=1e-5, rtol=1e-5)
    assert jnp.allclose(jnp.sum(out, axis=-1), 1.0, atol=1e-5)

    print("KERNEL_OK")
</pallas_src>

<mosaic_0001>
module attributes {stable_mosaic.version = 11 : i64} {
  func.func @_gating_kernel(%arg0: i32, %arg1: memref<3x6xf32, #tpu.memory_space<smem>>, %arg2: memref<3xf32, #tpu.memory_space<smem>>, %arg3: memref<6x256xf32, #tpu.memory_space<vmem>>, %arg4: memref<3x256xf32, #tpu.memory_space<vmem>>) attributes {dimension_semantics = [#tpu.dimension_semantics<parallel>], iteration_bounds = array<i64: 1>, scalar_prefetch = 0 : i64, scratch_operands = 0 : i64, tpu.core_type = #tpu.core_type<tc>, window_params = [{transform_indices = @transform_0, window_bounds = array<i64: 3, 6>}, {transform_indices = @transform_1, window_bounds = array<i64: 3>}, {transform_indices = @transform_2, window_bounds = array<i64: 6, 256>}, {transform_indices = @transform_3, window_bounds = array<i64: 3, 256>}]} {
    %c0 = arith.constant 0 : index
    %c0_0 = arith.constant 0 : index
    %0 = vector.load %arg3[%c0, %c0_0] : memref<6x256xf32, #tpu.memory_space<vmem>>, vector<6x256xf32>
    %c0_1 = arith.constant 0 : index
    %1 = memref.load %arg2[%c0_1] : memref<3xf32, #tpu.memory_space<smem>>
    %c0_2 = arith.constant 0 : index
    %c0_3 = arith.constant 0 : index
    %2 = memref.load %arg1[%c0_2, %c0_3] : memref<3x6xf32, #tpu.memory_space<smem>>
    %3 = vector.extract_strided_slice %0 {offsets = [0, 0], sizes = [1, 256], strides = [1, 1]} : vector<6x256xf32> to vector<1x256xf32>
    %4 = vector.broadcast %2 : f32 to vector<1x256xf32>
    %5 = arith.mulf %4, %3 : vector<1x256xf32>
    %6 = vector.broadcast %1 : f32 to vector<1x256xf32>
    %7 = arith.addf %6, %5 : vector<1x256xf32>
    %c0_4 = arith.constant 0 : index
    %c1 = arith.constant 1 : index
    %8 = memref.load %arg1[%c0_4, %c1] : memref<3x6xf32, #tpu.memory_space<smem>>
    %9 = vector.extract_strided_slice %0 {offsets = [1, 0], sizes = [1, 256], strides = [1, 1]} : vector<6x256xf32> to vector<1x256xf32>
    %10 = vector.broadcast %8 : f32 to vector<1x256xf32>
    %11 = arith.mulf %10, %9 : vector<1x256xf32>
    %12 = arith.addf %7, %11 : vector<1x256xf32>
    %c0_5 = arith.constant 0 : index
    %c2 = arith.constant 2 : index
    %13 = memref.load %arg1[%c0_5, %c2] : memref<3x6xf32, #tpu.memory_space<smem>>
    %14 = vector.extract_strided_slice %0 {offsets = [2, 0], sizes = [1, 256], strides = [1, 1]} : vector<6x256xf32> to vector<1x256xf32>
    %15 = vector.broadcast %13 : f32 to vector<1x256xf32>
    %16 = arith.mulf %15, %14 : vector<1x256xf32>
    %17 = arith.addf %12, %16 : vector<1x256xf32>
    %c0_6 = arith.constant 0 : index
    %c3 = arith.constant 3 : index
    %18 = memref.load %arg1[%c0_6, %c3] : memref<3x6xf32, #tpu.memory_space<smem>>
    %19 = vector.extract_strided_slice %0 {offsets = [3, 0], sizes = [1, 256], strides = [1, 1]} : vector<6x256xf32> to vector<1x256xf32>
    %20 = vector.broadcast %18 : f32 to vector<1x256xf32>
    %21 = arith.mulf %20, %19 : vector<1x256xf32>
    %22 = arith.addf %17, %21 : vector<1x256xf32>
    %c0_7 = arith.constant 0 : index
    %c4 = arith.constant 4 : index
    %23 = memref.load %arg1[%c0_7, %c4] : memref<3x6xf32, #tpu.memory_space<smem>>
    %24 = vector.extract_strided_slice %0 {offsets = [4, 0], sizes = [1, 256], strides = [1, 1]} : vector<6x256xf32> to vector<1x256xf32>
    %25 = vector.broadcast %23 : f32 to vector<1x256xf32>
    %26 = arith.mulf %25, %24 : vector<1x256xf32>
    %27 = arith.addf %22, %26 : vector<1x256xf32>
    %c0_8 = arith.constant 0 : index
    %c5 = arith.constant 5 : index
    %28 = memref.load %arg1[%c0_8, %c5] : memref<3x6xf32, #tpu.memory_space<smem>>
    %29 = vector.extract_strided_slice %0 {offsets = [5, 0], sizes = [1, 256], strides = [1, 1]} : vector<6x256xf32> to vector<1x256xf32>
    %30 = vector.broadcast %28 : f32 to vector<1x256xf32>
    %31 = arith.mulf %30, %29 : vector<1x256xf32>
    %32 = arith.addf %27, %31 : vector<1x256xf32>
    %c1_9 = arith.constant 1 : index
    %33 = memref.load %arg2[%c1_9] : memref<3xf32, #tpu.memory_space<smem>>
    %c1_10 = arith.constant 1 : index
    %c0_11 = arith.constant 0 : index
    %34 = memref.load %arg1[%c1_10, %c0_11] : memref<3x6xf32, #tpu.memory_space<smem>>
    %35 = vector.extract_strided_slice %0 {offsets = [0, 0], sizes = [1, 256], strides = [1, 1]} : vector<6x256xf32> to vector<1x256xf32>
    %36 = vector.broadcast %34 : f32 to vector<1x256xf32>
    %37 = arith.mulf %36, %35 : vector<1x256xf32>
    %38 = vector.broadcast %33 : f32 to vector<1x256xf32>
    %39 = arith.addf %38, %37 : vector<1x256xf32>
    %c1_12 = arith.constant 1 : index
    %c1_13 = arith.constant 1 : index
    %40 = memref.load %arg1[%c1_12, %c1_13] : memref<3x6xf32, #tpu.memory_space<smem>>
    %41 = vector.extract_strided_slice %0 {offsets = [1, 0], sizes = [1, 256], strides = [1, 1]} : vector<6x256xf32> to vector<1x256xf32>
    %42 = vector.broadcast %40 : f32 to vector<1x256xf32>
    %43 = arith.mulf %42, %41 : vector<1x256xf32>
    %44 = arith.addf %39, %43 : vector<1x256xf32>
    %c1_14 = arith.constant 1 : index
    %c2_15 = arith.constant 2 : index
    %45 = memref.load %arg1[%c1_14, %c2_15] : memref<3x6xf32, #tpu.memory_space<smem>>
    %46 = vector.extract_strided_slice %0 {offsets = [2, 0], sizes = [1, 256], strides = [1, 1]} : vector<6x256xf32> to vector<1x256xf32>
    %47 = vector.broadcast %45 : f32 to vector<1x256xf32>
    %48 = arith.mulf %47, %46 : vector<1x256xf32>
    %49 = arith.addf %44, %48 : vector<1x256xf32>
    %c1_16 = arith.constant 1 : index
    %c3_17 = arith.constant 3 : index
    %50 = memref.load %arg1[%c1_16, %c3_17] : memref<3x6xf32, #tpu.memory_space<smem>>
    %51 = vector.extract_strided_slice %0 {offsets = [3, 0], sizes = [1, 256], strides = [1, 1]} : vector<6x256xf32> to vector<1x256xf32>
    %52 = vector.broadcast %50 : f32 to vector<1x256xf32>
    %53 = arith.mulf %52, %51 : vector<1x256xf32>
    %54 = arith.addf %49, %53 : vector<1x256xf32>
    %c1_18 = arith.constant 1 : index
    %c4_19 = arith.constant 4 : index
    %55 = memref.load %arg1[%c1_18, %c4_19] : memref<3x6xf32, #tpu.memory_space<smem>>
    %56 = vector.extract_strided_slice %0 {offsets = [4, 0], sizes = [1, 256], strides = [1, 1]} : vector<6x256xf32> to vector<1x256xf32>
    %57 = vector.broadcast %55 : f32 to vector<1x256xf32>
    %58 = arith.mulf %57, %56 : vector<1x256xf32>
    %59 = arith.addf %54, %58 : vector<1x256xf32>
    %c1_20 = arith.constant 1 : index
    %c5_21 = arith.constant 5 : index
    %60 = memref.load %arg1[%c1_20, %c5_21] : memref<3x6xf32, #tpu.memory_space<smem>>
    %61 = vector.extract_strided_slice %0 {offsets = [5, 0], sizes = [1, 256], strides = [1, 1]} : vector<6x256xf32> to vector<1x256xf32>
    %62 = vector.broadcast %60 : f32 to vector<1x256xf32>
    %63 = arith.mulf %62, %61 : vector<1x256xf32>
    %64 = arith.addf %59, %63 : vector<1x256xf32>
    %c2_22 = arith.constant 2 : index
    %65 = memref.load %arg2[%c2_22] : memref<3xf32, #tpu.memory_space<smem>>
    %c2_23 = arith.constant 2 : index
    %c0_24 = arith.constant 0 : index
    %66 = memref.load %arg1[%c2_23, %c0_24] : memref<3x6xf32, #tpu.memory_space<smem>>
    %67 = vector.extract_strided_slice %0 {offsets = [0, 0], sizes = [1, 256], strides = [1, 1]} : vector<6x256xf32> to vector<1x256xf32>
    %68 = vector.broadcast %66 : f32 to vector<1x256xf32>
    %69 = arith.mulf %68, %67 : vector<1x256xf32>
    %70 = vector.broadcast %65 : f32 to vector<1x256xf32>
    %71 = arith.addf %70, %69 : vector<1x256xf32>
    %c2_25 = arith.constant 2 : index
    %c1_26 = arith.constant 1 : index
    %72 = memref.load %arg1[%c2_25, %c1_26] : memref<3x6xf32, #tpu.memory_space<smem>>
    %73 = vector.extract_strided_slice %0 {offsets = [1, 0], sizes = [1, 256], strides = [1, 1]} : vector<6x256xf32> to vector<1x256xf32>
    %74 = vector.broadcast %72 : f32 to vector<1x256xf32>
    %75 = arith.mulf %74, %73 : vector<1x256xf32>
    %76 = arith.addf %71, %75 : vector<1x256xf32>
    %c2_27 = arith.constant 2 : index
    %c2_28 = arith.constant 2 : index
    %77 = memref.load %arg1[%c2_27, %c2_28] : memref<3x6xf32, #tpu.memory_space<smem>>
    %78 = vector.extract_strided_slice %0 {offsets = [2, 0], sizes = [1, 256], strides = [1, 1]} : vector<6x256xf32> to vector<1x256xf32>
    %79 = vector.broadcast %77 : f32 to vector<1x256xf32>
    %80 = arith.mulf %79, %78 : vector<1x256xf32>
    %81 = arith.addf %76, %80 : vector<1x256xf32>
    %c2_29 = arith.constant 2 : index
    %c3_30 = arith.constant 3 : index
    %82 = memref.load %arg1[%c2_29, %c3_30] : memref<3x6xf32, #tpu.memory_space<smem>>
    %83 = vector.extract_strided_slice %0 {offsets = [3, 0], sizes = [1, 256], strides = [1, 1]} : vector<6x256xf32> to vector<1x256xf32>
    %84 = vector.broadcast %82 : f32 to vector<1x256xf32>
    %85 = arith.mulf %84, %83 : vector<1x256xf32>
    %86 = arith.addf %81, %85 : vector<1x256xf32>
    %c2_31 = arith.constant 2 : index
    %c4_32 = arith.constant 4 : index
    %87 = memref.load %arg1[%c2_31, %c4_32] : memref<3x6xf32, #tpu.memory_space<smem>>
    %88 = vector.extract_strided_slice %0 {offsets = [4, 0], sizes = [1, 256], strides = [1, 1]} : vector<6x256xf32> to vector<1x256xf32>
    %89 = vector.broadcast %87 : f32 to vector<1x256xf32>
    %90 = arith.mulf %89, %88 : vector<1x256xf32>
    %91 = arith.addf %86, %90 : vector<1x256xf32>
    %c2_33 = arith.constant 2 : index
    %c5_34 = arith.constant 5 : index
    %92 = memref.load %arg1[%c2_33, %c5_34] : memref<3x6xf32, #tpu.memory_space<smem>>
    %93 = vector.extract_strided_slice %0 {offsets = [5, 0], sizes = [1, 256], strides = [1, 1]} : vector<6x256xf32> to vector<1x256xf32>
    %94 = vector.broadcast %92 : f32 to vector<1x256xf32>
    %95 = arith.mulf %94, %93 : vector<1x256xf32>
    %96 = arith.addf %91, %95 : vector<1x256xf32>
    %97 = arith.maximumf %32, %64 : vector<1x256xf32>
    %98 = arith.maximumf %97, %96 : vector<1x256xf32>
    %99 = arith.subf %32, %98 : vector<1x256xf32>
    %100 = math.exp %99 : vector<1x256xf32>
    %101 = arith.subf %64, %98 : vector<1x256xf32>
    %102 = math.exp %101 : vector<1x256xf32>
    %103 = arith.subf %96, %98 : vector<1x256xf32>
    %104 = math.exp %103 : vector<1x256xf32>
    %105 = arith.addf %100, %102 : vector<1x256xf32>
    %106 = arith.addf %105, %104 : vector<1x256xf32>
    %cst = arith.constant 1.000000e+00 : f32
    %107 = vector.broadcast %cst : f32 to vector<1x256xf32>
    %108 = arith.divf %107, %106 : vector<1x256xf32>
    %109 = arith.mulf %100, %108 : vector<1x256xf32>
    %cst_35 = arith.constant 0.00999999977 : f32
    %cst_36 = arith.constant 9.900000e-01 : f32
    %110 = vector.broadcast %cst_35 : f32 to vector<1x256xf32>
    %111 = arith.maximumf %110, %109 : vector<1x256xf32>
    %112 = vector.broadcast %cst_36 : f32 to vector<1x256xf32>
    %113 = arith.minimumf %112, %111 : vector<1x256xf32>
    %114 = arith.mulf %102, %108 : vector<1x256xf32>
    %cst_37 = arith.constant 0.00999999977 : f32
    %cst_38 = arith.constant 9.900000e-01 : f32
    %115 = vector.broadcast %cst_37 : f32 to vector<1x256xf32>
    %116 = arith.maximumf %115, %114 : vector<1x256xf32>
    %117 = vector.broadcast %cst_38 : f32 to vector<1x256xf32>
    %118 = arith.minimumf %117, %116 : vector<1x256xf32>
    %119 = arith.mulf %104, %108 : vector<1x256xf32>
    %cst_39 = arith.constant 0.00999999977 : f32
    %cst_40 = arith.constant 9.900000e-01 : f32
    %120 = vector.broadcast %cst_39 : f32 to vector<1x256xf32>
    %121 = arith.maximumf %120, %119 : vector<1x256xf32>
    %122 = vector.broadcast %cst_40 : f32 to vector<1x256xf32>
    %123 = arith.minimumf %122, %121 : vector<1x256xf32>
    %124 = arith.addf %113, %118 : vector<1x256xf32>
    %125 = arith.addf %124, %123 : vector<1x256xf32>
    %cst_41 = arith.constant 1.000000e+00 : f32
    %126 = vector.broadcast %cst_41 : f32 to vector<1x256xf32>
    %127 = arith.divf %126, %125 : vector<1x256xf32>
    %128 = arith.mulf %113, %127 : vector<1x256xf32>
    %129 = arith.mulf %118, %127 : vector<1x256xf32>
    %130 = arith.mulf %123, %127 : vector<1x256xf32>
    %131 = tpu.concatenate %128, %129, %130 in 0 : vector<1x256xf32>, vector<1x256xf32>, vector<1x256xf32> -> vector<3x256xf32>
    %c0_42 = arith.constant 0 : index
    %c0_43 = arith.constant 0 : index
    %132 = vector.load %arg4[%c0_42, %c0_43] : memref<3x256xf32, #tpu.memory_space<vmem>>, vector<3x256xf32>
    tpu.vector_store %arg4[%c0_42, %c0_43], %131 {strides = array<i32>} : memref<3x256xf32, #tpu.memory_space<vmem>>, vector<3x256xf32>,
    return
  }
  func.func @transform_0(%arg0: i32) -> (i32, i32) {
    %c0_i32 = arith.constant 0 : i32
    %c0_i32_0 = arith.constant 0 : i32
    %c0_i32_1 = arith.constant 0 : i32
    return %c0_i32, %c0_i32_0 : i32, i32
  }
  func.func @transform_1(%arg0: i32) -> i32 {
    %c0_i32 = arith.constant 0 : i32
    %c0_i32_0 = arith.constant 0 : i32
    return %c0_i32 : i32
  }
  func.func @transform_2(%arg0: i32) -> (i32, i32) {
    %c0_i32 = arith.constant 0 : i32
    %c0_i32_0 = arith.constant 0 : i32
    return %c0_i32, %arg0 : i32, i32
  }
  func.func @transform_3(%arg0: i32) -> (i32, i32) {
    %c0_i32 = arith.constant 0 : i32
    %c0_i32_0 = arith.constant 0 : i32
    return %c0_i32, %arg0 : i32, i32
  }
}

</mosaic_0001>

<bundles_post_ra>
// kernel: tpu_custom_call.1
= control target key start
LH: loop header
LB: loop body
LE: loop exit
PB: predicated region body
PF: predicated region fallthrough
CT: control target
= control target key end

     0   :  { %8 = vsyncpa [#allocation5], 0  ;;  %s672_s0 = inlined_call_operand.hbm [shape: f32[3,6], index: 0, kind: input, shape index: {}]   ;;  %s673_s1 = inlined_call_operand.hbm [shape: f32[3], index: 1, kind: input, shape index: {}]   ;;  %s674_s2 = inlined_call_operand.hbm [shape: f32[6,256], index: 2, kind: input, shape index: {}]   ;;  %s675_s3 = inlined_call_operand.hbm [shape: f32[3,256], index: 3, kind: output, shape index: {}]  }
   0x1   :  { %9 = vsyncpa [#allocation7], 0 }
   0x2   :  { %10 = vsyncpa [#allocation3], 0 }
   0x3   :  { %11 = vsyncpa [#allocation4], 0  ;;  %s17_s14 = sshll.u32 %s672_s0, 4  ;;  %s26_s17 = sshll.u32 %s673_s1, 4  ;;  %s18_s14 = int_to_ptr.hbm [resolvable:$true] %s17_s14  ;;  %s27_s17 = int_to_ptr.hbm [resolvable:$true] %s26_s17 }
   0x4   :  { %s541_s18 = smov [#allocation2]   ;;  %s542_s19 = smov [#allocation6]  }
   0x5   :  { %20 = dma.hbm_to_smem %s18_s14, 64, %s541_s18, [#allocation5]  }
   0x6   :  { %29 = dma.hbm_to_smem %s27_s17, 16, %s542_s19, [#allocation7]  }
   0x7   :  { %s35_s22 = sshll.u32 %s674_s2, 4  ;;  %s543_s23 = smov [#allocation8]   ;;  %s36_s22 = int_to_ptr.hbm [resolvable:$true] %s35_s22 }
   0x8   :  { %s37_s24 = sshll.u32 %s543_s23, 4  ;;  %s38_s24 = int_to_ptr.vmem [resolvable:$true] %s37_s24 }
   0x9   :  { %40 = dma.hbm_to_vmem [thread:$0]  %s36_s22, 256, %s38_s24, [#allocation3]  }
   0xa   :  { %533 = dma.done.wait [#allocation5], 64  }
   0xb   :  { %534 = vsyncadd [#allocation5], 4294967232 }
   0xc   :  { %535 = dma.done.wait [#allocation7], 16  }
   0xd   :  { %536 = vsyncadd [#allocation7], 4294967280 }
   0xe   :  { %537 = dma.done.wait [#allocation3], 256  }
   0xf   :  { %538 = vsyncadd [#allocation3], 4294967040 }
  0x10   :  { %53 = sfence }
  0x11   :  { %s56_s0 = sld [smem:[#allocation6]]  ;;  %v574_v0 = vld [vmem:[#allocation8] sm:$0x3f]  ;;  %v576_v1 = vld [vmem:[#allocation8 + $0x8] sm:$0x3f]  ;;  %s544_s16 = smov [#allocation9]  }
  0x12   :  { %s57_s1 = sld [smem:[#allocation2]]  ;;  %s404_s17 = sshll.u32 %s544_s16, 4  ;;  %s405_s17 = int_to_ptr.vmem [resolvable:$true] %s404_s17 }
  0x13   :  { %s418_s25 = sld [smem:[#allocation2 + $0x1]]  ;;  %s406_s20 = sshll.u32 %s675_s3, 4  ;;  %s407_s20 = int_to_ptr.hbm [resolvable:$true] %s406_s20 }
  0x14   :  { %s419_s26 = sld [smem:[#allocation2 + $0x2]] }
  0x15   :  { %s420_s27 = sld [smem:[#allocation2 + $0x3]] }
  0x16   :  { %s578_s2 = sld [smem:[#allocation2 + $0x4]] }
  0x17   :  { %s580_s28 = sld [smem:[#allocation2 + $0x5]]  ;;  %v61_v3 = vstv %s56_s0 }
  0x18   :  { %v58_v2 = vstv %s57_s1  ;;  %s582_s29 = sld [smem:[#allocation6 + $0x1]] }
  0x19   :  { %v59_v4 = vmul.f32 %v58_v2, %v574_v0  ;;  %v60_v5 = vmul.f32 %v58_v2, %v576_v1  ;;  %v65_v6 = vstv %s418_s25  ;;  %s586_s30 = sld [smem:[#allocation2 + $0x80]] }
  0x1a   :  { %v66_v7 = vmul.f32 %v65_v6, %v574_v0  ;;  %v67_v8 = vmul.f32 %v65_v6, %v576_v1  ;;  %v77_v9 = vstv %s419_s26  ;;  %s590_s4 = sld [smem:[#allocation2 + $0x81]] }
  0x1b   :  { %v62_v10 = vadd.f32 %v61_v3, %v59_v4  ;;  %v63_v11 = vadd.f32 %v61_v3, %v60_v5  ;;  %v78_v12 = vmul.f32 %v77_v9, %v574_v0  ;;  %v79_v13 = vmul.f32 %v77_v9, %v576_v1  ;;  %s594_s5 = sld [smem:[#allocation2 + $0x82]] }
  0x1c   :  { %v70_v14 = vrot.slane %v66_v7, 1  ;;  %v71_v15 = vrot.slane %v67_v8, 1  ;;  %v89_v16 = vstv %s420_s27  ;;  %v101_v17 = vstv %s578_s2  ;;  %s597_s6 = sld [smem:[#allocation2 + $0x83]] }
  0x1d   :  { %v82_v18 = vrot.slane %v78_v12, 2  ;;  %v83_v19 = vrot.slane %v79_v13, 2  ;;  %v90_v20 = vmul.f32 %v89_v16, %v574_v0  ;;  %v91_v21 = vmul.f32 %v89_v16, %v576_v1  ;;  %s601_s7 = sld [smem:[#allocation2 + $0x84]] }
  0x1e   :  { %v74_v22 = vadd.f32 %v70_v14, %v62_v10  ;;  %v75_v23 = vadd.f32 %v71_v15, %v63_v11  ;;  %v102_v24 = vmul.f32 %v101_v17, %v574_v0  ;;  %v103_v25 = vmul.f32 %v101_v17, %v576_v1  ;;  %s605_s8 = sld [smem:[#allocation2 + $0x85]] }
  0x1f   :  { %v94_v26 = vrot.slane %v90_v20, 3  ;;  %v95_v27 = vrot.slane %v91_v21, 3  ;;  %v113_v28 = vstv %s580_s28  ;;  %v126_v29 = vstv %s586_s30  ;;  %s617_s9 = sld [smem:[#allocation6 + $0x2]] }
  0x20   :  { %v86_v30 = vadd.f32 %v82_v18, %v74_v22  ;;  %v87_v31 = vadd.f32 %v83_v19, %v75_v23  ;;  %v106_v32 = vrot.slane %v102_v24, 4  ;;  %v107_v33 = vrot.slane %v103_v25, 4  ;;  %s620_s10 = sld [smem:[#allocation2 + $0x100]] }
  0x21   :  { %v114_v34 = vmul.f32 %v113_v28, %v574_v0  ;;  %v611_v35 = vmul.f32 %v113_v28, %v576_v1  ;;  %v127_v36 = vmul.f32 %v126_v29, %v574_v0  ;;  %v128_v37 = vmul.f32 %v126_v29, %v576_v1  ;;  %s624_s11 = sld [smem:[#allocation2 + $0x101]] }
  0x22   :  { %v98_v38 = vadd.f32 %v94_v26, %v86_v30  ;;  %v99_v39 = vadd.f32 %v95_v27, %v87_v31  ;;  %v129_v40 = vstv %s582_s29  ;;  %v133_v41 = vstv %s590_s4  ;;  %s629_s12 = sld [smem:[#allocation2 + $0x102]] }
  0x23   :  { %v118_v42 = vrot.slane %v114_v34, 5  ;;  %v119_v43 = vrot.slane %v611_v35, 5  ;;  %v130_v44 = vadd.f32 %v129_v40, %v127_v36  ;;  %v131_v46 = vadd.f32 %v129_v40, %v128_v37  ;;  %s638_s13 = sld [smem:[#allocation2 + $0x103]] }
  0x24   :  { %v110_v45 = vadd.f32 %v106_v32, %v98_v38  ;;  %v134_v47 = vmul.f32 %v133_v41, %v574_v0  ;;  %v135_v48 = vmul.f32 %v133_v41, %v576_v1  ;;  %v111_v49 = vadd.f32 %v107_v33, %v99_v39  ;;  %s642_s14 = sld [smem:[#allocation2 + $0x104]] }
  0x25   :  { %v145_v50 = vstv %s594_s5  ;;  %v157_v51 = vstv %s597_s6  ;;  %v169_v52 = vstv %s601_s7  ;;  %v181_v56 = vstv %s605_s8  ;;  %s648_s15 = sld [smem:[#allocation2 + $0x105]] }
  0x26   :  { %v631_v53 = vadd.f32 %v118_v42, %v110_v45  ;;  %v138_v54 = vrot.slane %v134_v47, 1  ;;  %v139_v55 = vrot.slane %v135_v48, 1  ;;  %v146_v57 = vmul.f32 %v145_v50, %v574_v0 }
  0x27   :  { %v147_v58 = vmul.f32 %v145_v50, %v576_v1  ;;  %v158_v59 = vmul.f32 %v157_v51, %v574_v0  ;;  %v159_v60 = vmul.f32 %v157_v51, %v576_v1  ;;  %v170_v63 = vmul.f32 %v169_v52, %v574_v0 }
  0x28   :  { %v142_v61 = vadd.f32 %v138_v54, %v130_v44  ;;  %v143_v62 = vadd.f32 %v139_v55, %v131_v46  ;;  %v171_v2 = vmul.f32 %v169_v52, %v576_v1  ;;  %v150_v3 = vrot.slane %v146_v57, 2 }
  0x29   :  { %v151_v4 = vrot.slane %v147_v58, 2  ;;  %v162_v5 = vrot.slane %v158_v59, 3  ;;  %v163_v6 = vrot.slane %v159_v60, 3  ;;  %v174_v7 = vrot.slane %v170_v63, 4 }
  0x2a   :  { %v175_v8 = vrot.slane %v171_v2, 4  ;;  %v182_v9 = vmul.f32 %v181_v56, %v574_v0  ;;  %v183_v10 = vmul.f32 %v181_v56, %v576_v1  ;;  %v154_v11 = vadd.f32 %v150_v3, %v142_v61 }
  0x2b   :  { %v155_v12 = vadd.f32 %v151_v4, %v143_v62  ;;  %v194_v13 = vstv %s620_s10  ;;  %v197_v14 = vstv %s617_s9  ;;  %v201_v21 = vstv %s624_s11 }
  0x2c   :  { %v186_v15 = vrot.slane %v182_v9, 5  ;;  %v187_v16 = vrot.slane %v183_v10, 5  ;;  %v195_v17 = vmul.f32 %v194_v13, %v574_v0  ;;  %v196_v18 = vmul.f32 %v194_v13, %v576_v1 }
  0x2d   :  { %v166_v19 = vadd.f32 %v162_v5, %v154_v11  ;;  %v167_v20 = vadd.f32 %v163_v6, %v155_v12  ;;  %v213_v22 = vstv %s629_s12  ;;  %v202_v25 = vmul.f32 %v201_v21, %v574_v0 }
  0x2e   :  { %v198_v23 = vadd.f32 %v197_v14, %v195_v17  ;;  %v199_v24 = vadd.f32 %v197_v14, %v196_v18  ;;  %v203_v26 = vmul.f32 %v201_v21, %v576_v1  ;;  %v214_v29 = vmul.f32 %v213_v22, %v574_v0 }
  0x2f   :  { %v178_v27 = vadd.f32 %v174_v7, %v166_v19  ;;  %v179_v28 = vadd.f32 %v175_v8, %v167_v20  ;;  %v215_v30 = vmul.f32 %v213_v22, %v576_v1  ;;  %v206_v31 = vrot.slane %v202_v25, 1 }
  0x30   :  { %v207_v32 = vrot.slane %v203_v26, 1  ;;  %v225_v33 = vstv %s638_s13  ;;  %v237_v34 = vstv %s642_s14  ;;  %v123_v35 = vadd.f32 %v119_v43, %v111_v49 }
  0x31   :  { %v190_v36 = vadd.f32 %v186_v15, %v178_v27  ;;  %v218_v37 = vrot.slane %v214_v29, 2  ;;  %v219_v38 = vrot.slane %v215_v30, 2  ;;  %v210_v39 = vadd.f32 %v206_v31, %v198_v23 }
  0x32   :  { %v211_v40 = vadd.f32 %v207_v32, %v199_v24  ;;  %v226_v41 = vmul.f32 %v225_v33, %v574_v0  ;;  %v227_v42 = vmul.f32 %v225_v33, %v576_v1  ;;  %v191_v44 = vadd.f32 %v187_v16, %v179_v28 }
  0x33   :  { %v238_v45 = vmul.f32 %v237_v34, %v574_v0  ;;  %v239_v46 = vmul.f32 %v237_v34, %v576_v1  ;;  %v249_v47 = vstv %s648_s15  ;;  %v222_v48 = vadd.f32 %v218_v37, %v210_v39 }
  0x34   :  { %v223_v50 = vadd.f32 %v219_v38, %v211_v40  ;;  %v230_v51 = vrot.slane %v226_v41, 3  ;;  %v231_v52 = vrot.slane %v227_v42, 3  ;;  %v250_v54 = vmul.f32 %v249_v47, %v574_v0 }
  0x35   :  { %v242_v43 = vrot.slane %v238_v45, 4  ;;  %v243_v49 = vrot.slane %v239_v46, 4  ;;  %v251_v55 = vmul.f32 %v249_v47, %v576_v1  ;;  %v260_v62 = vmax.f32 %v631_v53, %v190_v36 }
  0x36   :  { %v234_v56 = vadd.f32 %v230_v51, %v222_v48  ;;  %v235_v57 = vadd.f32 %v231_v52, %v223_v50  ;;  %v254_v58 = vrot.slane %v250_v54, 5  ;;  %v261_v63 = vmax.f32 %v123_v35, %v191_v44 }
  0x37   :  { %v255_v59 = vrot.slane %v251_v55, 5 }
  0x38   :  { %v246_v60 = vadd.f32 %v242_v43, %v234_v56  ;;  %v247_v61 = vadd.f32 %v243_v49, %v235_v57 }
  0x3a   :  { %v258_v2 = vadd.f32 %v254_v58, %v246_v60  ;;  %v259_v3 = vadd.f32 %v255_v59, %v247_v61 }
  0x3c   :  { %v262_v4 = vmax.f32 %v260_v62, %v258_v2  ;;  %v263_v5 = vmax.f32 %v261_v63, %v259_v3 }
  0x3e   :  { %v264_v6 = vsub.f32 %v631_v53, %v262_v4  ;;  %v265_v7 = vsub.f32 %v123_v35, %v263_v5  ;;  %v270_v8 = vsub.f32 %v190_v36, %v262_v4  ;;  %v271_v0 = vsub.f32 %v191_v44, %v263_v5 }
  0x3f   :  { %v276_v9 = vsub.f32 %v258_v2, %v262_v4  ;;  %v277_v1 = vsub.f32 %v259_v3, %v263_v5 }
  0x40   :  { %v266_v10 = vmul.f32 1.442695, %v264_v6  ;;  %v268_v11 = vmul.f32 1.442695, %v265_v7  ;;  %v272_v12 = vmul.f32 1.442695, %v270_v8 }
  0x41   :  { %v274_v13 = vmul.f32 1.442695, %v271_v0  ;;  %v278_v14 = vmul.f32 1.442695, %v276_v9  ;;  %v280_v15 = vmul.f32 1.442695, %v277_v1 }
  0x42   :  { %441 = vpow2.f32 %v266_v10 }
  0x43   :  { %443 = vpow2.f32 %v268_v11 }
  0x44   :  { %445 = vpow2.f32 %v272_v12 }
  0x45   :  { %447 = vpow2.f32 %v274_v13 }
  0x46   :  { %449 = vpow2.f32 %v278_v14 }
  0x47   :  { %451 = vpow2.f32 %v280_v15 }
  0x48   :  { %v442_v16 = vpop.eup %441 }
  0x49   :  { %v444_v17 = vpop.eup %443 }
  0x4a   :  { %v446_v53 = vpop.eup %445 }
  0x4b   :  { %v448_v18 = vpop.eup %447  ;;  %v282_v19 = vadd.f32 %v446_v53, %v442_v16 }
  0x4c   :  { %v450_v20 = vpop.eup %449  ;;  %v283_v21 = vadd.f32 %v448_v18, %v444_v17 }
  0x4d   :  { %v452_v22 = vpop.eup %451  ;;  %v284_v23 = vadd.f32 %v450_v20, %v282_v19 }
  0x4e   :  { %v285_v24 = vadd.f32 %v452_v22, %v283_v21 }
  0x4f   :  { %453 = vrcp.f32 %v284_v23  ;;  %vm291_vm0 = vweird.f32 %v284_v23  ;;  %v297_v28 = vand.u32 2147483648, %v284_v23  ;;  %v295_v31 = vand.u32 2147483647, %v284_v23 }
  0x50   :  { %455 = vrcp.f32 %v285_v24  ;;  %v312_v32 = vand.u32 2147483648, %v285_v24  ;;  %vm306_vm2 = vweird.f32 %v285_v24  ;;  %v310_v34 = vand.u32 2147483647, %v285_v24 }
  0x51   :  { %v298_v36 = vor.u32 1.1754944e-38, %v297_v28  ;;  %vm296_vm5 = vcmp.eq.f32.partialorder %v295_v31, 8.507059e+37 }
  0x52   :  { %v313_v39 = vor.u32 1.1754944e-38, %v312_v32  ;;  %vm311_vm7 = vcmp.eq.f32.partialorder %v310_v34, 8.507059e+37 }
  0x55   :  { %v454_v25 = vpop.eup %453 }
  0x56   :  { %v456_v26 = vpop.eup %455  ;;  %v287_v27 = vmul.f32 %v454_v25, %v284_v23  ;;  %vm292_vm1 = vweird.f32 %v454_v25 }
  0x57   :  { %v302_v29 = vmul.f32 %v456_v26, %v285_v24  ;;  %vm307_vm3 = vweird.f32 %v456_v26  ;;  %vm293_vm4 = vmor %vm291_vm0, %vm292_vm1  ;;  %vm386_vm0 = vcmask 1040384   ;;  %vm389_vm1 = vcmask 1041408  }
  0x58   :  { %v288_v30 = vsub.f32 1.0, %v287_v27  ;;  %vm308_vm6 = vmor %vm306_vm2, %vm307_vm3  ;;  %vm395_vm2 = vcmask 1043456  }
  0x59   :  { %v303_v33 = vsub.f32 1.0, %v302_v29 }
  0x5a   :  { %v289_v35 = vmul.f32 %v454_v25, %v288_v30 }
  0x5b   :  { %v304_v37 = vmul.f32 %v456_v26, %v303_v33 }
  0x5c   :  { %v290_v38 = vadd.f32 %v454_v25, %v289_v35 }
  0x5d   :  { %v305_v40 = vadd.f32 %v456_v26, %v304_v37 }
  0x5e   :  { %v294_v41 = vsel %vm293_vm4, %v454_v25, %v290_v38 }
  0x5f   :  { %v299_v42 = vsel %vm296_vm5, %v298_v36, %v294_v41  ;;  %v309_v44 = vsel %vm308_vm6, %v456_v26, %v305_v40 }
  0x60   :  { %v314_v45 = vsel %vm311_vm7, %v313_v39, %v309_v44  ;;  %v316_v46 = vmul.f32 %v442_v16, %v299_v42  ;;  %v322_v47 = vmul.f32 %v446_v53, %v299_v42  ;;  %v328_v48 = vmul.f32 %v450_v20, %v299_v42 }
  0x61   :  { %v317_v50 = vmul.f32 %v444_v17, %v314_v45  ;;  %v323_v51 = vmul.f32 %v448_v18, %v314_v45  ;;  %v329_v52 = vmul.f32 %v452_v22, %v314_v45 }
  0x62   :  { %v318_v43 = vmax.f32 %v316_v46, 0.01  ;;  %v324_v49 = vmax.f32 %v322_v47, 0.01  ;;  %v330_v54 = vmax.f32 %v328_v48, 0.01 }
  0x63   :  { %v319_v55 = vmax.f32 %v317_v50, 0.01  ;;  %v325_v56 = vmax.f32 %v323_v51, 0.01  ;;  %v331_v57 = vmax.f32 %v329_v52, 0.01 }
  0x64   :  { %v320_v58 = vmin.f32 %v318_v43, 0.99  ;;  %v326_v59 = vmin.f32 %v324_v49, 0.99  ;;  %v332_v60 = vmin.f32 %v330_v54, 0.99 }
  0x65   :  { %v321_v61 = vmin.f32 %v319_v55, 0.99  ;;  %v327_v62 = vmin.f32 %v325_v56, 0.99  ;;  %v333_v63 = vmin.f32 %v331_v57, 0.99 }
  0x66   :  { %v334_v2 = vadd.f32 %v326_v59, %v320_v58 }
  0x67   :  { %v335_v3 = vadd.f32 %v327_v62, %v321_v61 }
  0x68   :  { %v336_v4 = vadd.f32 %v334_v2, %v332_v60 }
  0x69   :  { %v337_v5 = vadd.f32 %v335_v3, %v333_v63 }
  0x6a   :  { %457 = vrcp.f32 %v336_v4  ;;  %vm343_vm8 = vweird.f32 %v336_v4  ;;  %v349_v0 = vand.u32 2147483648, %v336_v4  ;;  %v347_v10 = vand.u32 2147483647, %v336_v4 }
  0x6b   :  { %459 = vrcp.f32 %v337_v5  ;;  %v364_v11 = vand.u32 2147483648, %v337_v5  ;;  %vm358_vm10 = vweird.f32 %v337_v5  ;;  %v362_v13 = vand.u32 2147483647, %v337_v5 }
  0x6c   :  { %v350_v15 = vor.u32 1.1754944e-38, %v349_v0  ;;  %vm348_vm13 = vcmp.eq.f32.partialorder %v347_v10, 8.507059e+37 }
  0x6d   :  { %v365_v53 = vor.u32 1.1754944e-38, %v364_v11  ;;  %vm363_vm15 = vcmp.eq.f32.partialorder %v362_v13, 8.507059e+37 }
  0x70   :  { %v458_v6 = vpop.eup %457 }
  0x71   :  { %v460_v7 = vpop.eup %459  ;;  %v339_v8 = vmul.f32 %v458_v6, %v336_v4  ;;  %vm344_vm9 = vweird.f32 %v458_v6 }
  0x72   :  { %v354_v9 = vmul.f32 %v460_v7, %v337_v5  ;;  %vm359_vm11 = vweird.f32 %v460_v7  ;;  %vm345_vm12 = vmor %vm343_vm8, %vm344_vm9 }
  0x73   :  { %v340_v1 = vsub.f32 1.0, %v339_v8  ;;  %vm360_vm14 = vmor %vm358_vm10, %vm359_vm11 }
  0x74   :  { %v355_v12 = vsub.f32 1.0, %v354_v9 }
  0x75   :  { %v341_v14 = vmul.f32 %v458_v6, %v340_v1 }
  0x76   :  { %v356_v16 = vmul.f32 %v460_v7, %v355_v12 }
  0x77   :  { %v342_v17 = vadd.f32 %v458_v6, %v341_v14 }
  0x78   :  { %v357_v18 = vadd.f32 %v460_v7, %v356_v16 }
  0x79   :  { %v346_v19 = vsel %vm345_vm12, %v458_v6, %v342_v17 }
  0x7a   :  { %v351_v20 = vsel %vm348_vm13, %v350_v15, %v346_v19  ;;  %v361_v21 = vsel %vm360_vm14, %v460_v7, %v357_v18 }
  0x7b   :  { %v366_v22 = vsel %vm363_vm15, %v365_v53, %v361_v21  ;;  %v368_v23 = vmul.f32 %v351_v20, %v320_v58  ;;  %v370_v24 = vmul.f32 %v351_v20, %v326_v59  ;;  %v372_v25 = vmul.f32 %v351_v20, %v332_v60 }
  0x7c   :  { %v369_v26 = vmul.f32 %v366_v22, %v321_v61  ;;  %v371_v27 = vmul.f32 %v366_v22, %v327_v62  ;;  %v373_v28 = vmul.f32 %v366_v22, %v333_v63 }
  0x7d   :  { %v376_v29 = vrot.slane %v370_v24, 7  ;;  %v382_v30 = vrot.slane %v372_v25, 6 }
  0x7e   :  { %v377_v31 = vrot.slane %v371_v27, 7  ;;  %v383_v32 = vrot.slane %v373_v28, 6 }
  0x7f   :  { %v387_v33 = vsel %vm386_vm0, %v368_v23, %v376_v29 }
  0x80   :  { %v388_v34 = vsel %vm386_vm0, %v369_v26, %v377_v31  ;;  %v390_v35 = vsel %vm389_vm1, %v387_v33, %v382_v30 }
  0x81   :  { %v391_v36 = vsel %vm389_vm1, %v388_v34, %v383_v32 }
  0x82   :  { %v394_v37 = vrot.slane %v391_v36, 4 }
  0x84   :  { %v396_v38 = vsel %vm395_vm2, %v390_v35, %v394_v37 }
  0x85   :  { %398 = vst [vmem:[#allocation9] sm:$0x77] %v396_v38 }
  0x86   :  { %409 = dma.vmem_to_hbm [thread:$0]  %s405_s17, 128, %s407_s20, [#allocation4]  }
  0x87   :  { %539 = dma.done.wait [#allocation4], 128  }
  0x88   :  { %540 = vsyncadd [#allocation4], 4294967168 }
  0x89   :  { %414 = vsyncpa [#allocation3], 1 }
  0x8a   :  { %415 = vsyncpa [#allocation4], 1 }
  0x8b   :  { %416 = vsyncpa [#allocation5], 1 }
  0x8c   :  { %417 = vsyncpa [#allocation7], 1 }

</bundles_post_ra>
